<compile_context>
chip_gen: v7x
topology: tpu7x:2x2x1
jax: 0.10.0
libtpu: 0.0.40
codegen_flags: <defaults>
</compile_context>

<pallas_src>
import functools

import jax
import jax.numpy as jnp
from jax.experimental import pallas as pl
from jax.experimental.pallas import tpu as pltpu


def _round_up(n, m):
    return ((n + m - 1) // m) * m


def _tpu_config():
    """Returns (is_v7x, vmem_limit_bytes), robust to detection failures."""
    kind = ""
    try:
        kind = jax.devices()[0].device_kind.lower()
    except Exception:
        pass
    is_v7x = "7" in kind
    try:
        vmem_phys = int(pltpu.get_tpu_info().vmem_capacity_bytes)
    except Exception:
        # Conservative fallback: 64 MiB physical on v7x, 128 MiB elsewhere.
        vmem_phys = (64 if is_v7x else 128) * 1024 * 1024
    # Use at most half of physical VMEM, capped at 64 MiB:
    #   v5e/v6e (128 MiB physical) -> 64 MiB limit; v7x (64 MiB) -> 32 MiB.
    vmem_limit = min(64 * 1024 * 1024, vmem_phys // 2)
    return is_v7x, vmem_limit


def _entropy_kernel(x_ref, o_ref, acc_ref, *, neg_inv_b, k_total, block_k,
                    mask_rows):
    k = pl.program_id(1)  # reduction (K-block) axis, innermost / "arbitrary"

    @pl.when(k == 0)
    def _init():
        acc_ref[...] = jnp.zeros_like(acc_ref)

    x = x_ref[...].astype(jnp.float32)      # native dtype tile -> f32 in vregs
    xlogx = x * jnp.log(x)                  # VPU mul + EUP log

    if mask_rows:
        # The last K block extends past the true K rows: zero their
        # contribution BEFORE the accumulate (garbage rows would give NaN).
        rows = k * block_k + jax.lax.broadcasted_iota(jnp.int32, (block_k, 1), 0)
        xlogx = jnp.where(rows < k_total, xlogx, 0.0)

    # Fold block_k rows into 8 sublane groups: pure vector adds across vregs,
    # no per-step XLU reduce, no masked 1-row stores.
    acc_ref[...] += jnp.sum(
        xlogx.reshape(block_k // 8, 8, xlogx.shape[-1]), axis=0)

    @pl.when(k == pl.num_programs(1) - 1)
    def _finalize():
        # One sublane (XLU) reduce + scale, once per lane chunk.
        o_ref[...] = jnp.sum(acc_ref[...], axis=0, keepdims=True) * neg_inv_b


def entropy(x):
    """x: (B, C, H, W), strictly positive (float32 or bfloat16).  -> (H, W) f32."""
    B, C, H, W = x.shape
    K = B * C
    HW = H * W

    itemsize = jnp.dtype(x.dtype).itemsize
    # Sublane packing of the native-dtype input tile: 8 (f32), 16 (bf16), 32 (i8/fp8).
    sub = max(8, 32 // itemsize)

    is_v7x, vmem_limit = _tpu_config()

    # Lane split across TensorCores only where it helps (v7x: 2 TCs, EUP-bound);
    # on single-TC v5e/v6e keep one contiguous full-row slab per DMA.
    if is_v7x and HW % 256 == 0:
        n_lane = 2
    else:
        n_lane = 1
    lane_chunk = HW // n_lane   # == HW when n_lane == 1 (also covers HW % 128 != 0:
                                # block last dim == full array dim is allowed)

    # Size the K tile from the VMEM limit alone (no max_block_k cap):
    # ~2x double-buffered native input + ~3x f32 working values per element.
    bytes_per_row = lane_chunk * (2 * itemsize + 3 * 4)
    budget = int(vmem_limit * 0.6)
    tk = max(sub, (budget // bytes_per_row) // sub * sub)
    tk = min(tk, _round_up(K, sub))
    grid_k = pl.cdiv(K, tk)

    # Free, copy-less view of the input in its native dtype.
    x_flat = x.reshape(K, HW)

    kernel = functools.partial(
        _entropy_kernel,
        neg_inv_b=-1.0 / B,
        k_total=K,
        block_k=tk,
        mask_rows=(K % tk != 0),
    )

    out = pl.pallas_call(
        kernel,
        out_shape=jax.ShapeDtypeStruct((1, HW), jnp.float32),
        grid_spec=pltpu.PrefetchScalarGridSpec(
            num_scalar_prefetch=0,
            grid=(n_lane, grid_k),
            in_specs=[pl.BlockSpec((tk, lane_chunk), lambda j, k: (k, j))],
            out_specs=pl.BlockSpec((1, lane_chunk), lambda j, k: (0, j)),
            scratch_shapes=[pltpu.VMEM((8, lane_chunk), jnp.float32)],
        ),
        compiler_params=pltpu.CompilerParams(
            dimension_semantics=("parallel", "arbitrary"),
            vmem_limit_bytes=vmem_limit,
        ),
    )(x_flat)

    return out[0].reshape(H, W)


def entropy_ref(x):
    b = x.astype(jnp.float32) * jnp.log(x.astype(jnp.float32))
    b = b.sum(axis=1)
    return -1.0 * b.mean(axis=0)


if __name__ == "__main__":
    key = jax.random.PRNGKey(0)
    B, C, H, W = 2, 4, 16, 16
    # Strictly positive inputs so log(x) is finite (matches typical usage with
    # probabilities; the PyTorch module itself would NaN at 0).
    x = jax.random.uniform(
        key, (B, C, H, W), dtype=jnp.float32, minval=0.05, maxval=1.0
    )

    out = jax.block_until_ready(entropy(x))
    ref = entropy_ref(x)

    assert out.shape == (H, W), out.shape
    assert jnp.allclose(out, ref, atol=1e-5, rtol=1e-5), (
        float(jnp.max(jnp.abs(out - ref))))
    print("KERNEL_OK")
</pallas_src>

<mosaic_0001>
module attributes {stable_mosaic.version = 11 : i64} {
  func.func @_entropy_kernel(%arg0: i32, %arg1: i32, %arg2: memref<8x256xf32, #tpu.memory_space<vmem>>, %arg3: memref<1x256xf32, #tpu.memory_space<vmem>>, %arg4: memref<8x256xf32, #tpu.memory_space<vmem>>) attributes {dimension_semantics = [#tpu.dimension_semantics<parallel>, #tpu.dimension_semantics<arbitrary>], iteration_bounds = array<i64: 1, 1>, scalar_prefetch = 0 : i64, scratch_operands = 1 : i64, tpu.core_type = #tpu.core_type<tc>, window_params = [{transform_indices = @transform_0, window_bounds = array<i64: 8, 256>}, {transform_indices = @transform_1, window_bounds = array<i64: 1, 256>}]} {
    %c0_i32 = arith.constant 0 : i32
    %0 = arith.cmpi eq, %arg1, %c0_i32 : i32
    %1 = arith.extui %0 : i1 to i32
    %c0_i32_0 = arith.constant 0 : i32
    %2 = arith.cmpi ne, %1, %c0_i32_0 : i32
    scf.if %2 {
      %cst_8 = arith.constant 0.000000e+00 : f32
      %14 = vector.broadcast %cst_8 : f32 to vector<8x256xf32>
      %c0_9 = arith.constant 0 : index
      %c0_10 = arith.constant 0 : index
      %15 = vector.load %arg4[%c0_9, %c0_10] : memref<8x256xf32, #tpu.memory_space<vmem>>, vector<8x256xf32>
      tpu.vector_store %arg4[%c0_9, %c0_10], %14 {strides = array<i32>} : memref<8x256xf32, #tpu.memory_space<vmem>>, vector<8x256xf32>,
    } else {
    }
    %c0 = arith.constant 0 : index
    %c0_1 = arith.constant 0 : index
    %3 = vector.load %arg2[%c0, %c0_1] : memref<8x256xf32, #tpu.memory_space<vmem>>, vector<8x256xf32>
    %4 = math.log %3 : vector<8x256xf32>
    %5 = arith.mulf %3, %4 : vector<8x256xf32>
    %c0_2 = arith.constant 0 : index
    %c0_3 = arith.constant 0 : index
    %6 = vector.load %arg4[%c0_2, %c0_3] : memref<8x256xf32, #tpu.memory_space<vmem>>, vector<8x256xf32>
    %7 = vector.shape_cast %5 : vector<8x256xf32> to vector<1x8x256xf32>
    %cst = arith.constant dense<0.000000e+00> : vector<8x256xf32>
    %8 = vector.multi_reduction <add>, %7, %cst [0] : vector<1x8x256xf32> to vector<8x256xf32>
    %9 = arith.addf %6, %8 : vector<8x256xf32>
    %c0_4 = arith.constant 0 : index
    %c0_5 = arith.constant 0 : index
    %10 = vector.load %arg4[%c0_4, %c0_5] : memref<8x256xf32, #tpu.memory_space<vmem>>, vector<8x256xf32>
    tpu.vector_store %arg4[%c0_4, %c0_5], %9 {strides = array<i32>} : memref<8x256xf32, #tpu.memory_space<vmem>>, vector<8x256xf32>,
    %c0_i32_6 = arith.constant 0 : i32
    %11 = arith.cmpi eq, %arg1, %c0_i32_6 : i32
    %12 = arith.extui %11 : i1 to i32
    %c0_i32_7 = arith.constant 0 : i32
    %13 = arith.cmpi ne, %12, %c0_i32_7 : i32
    scf.if %13 {
      %c0_8 = arith.constant 0 : index
      %c0_9 = arith.constant 0 : index
      %14 = vector.load %arg4[%c0_8, %c0_9] : memref<8x256xf32, #tpu.memory_space<vmem>>, vector<8x256xf32>
      %cst_10 = arith.constant dense<0.000000e+00> : vector<256xf32>
      %15 = vector.multi_reduction <add>, %14, %cst_10 [0] : vector<8x256xf32> to vector<256xf32>
      %16 = vector.shape_cast %15 : vector<256xf32> to vector<1x256xf32>
      %cst_11 = arith.constant -5.000000e-01 : f32
      %17 = vector.broadcast %cst_11 : f32 to vector<1x256xf32>
      %18 = arith.mulf %16, %17 : vector<1x256xf32>
      %c0_12 = arith.constant 0 : index
      %c0_13 = arith.constant 0 : index
      %19 = vector.load %arg3[%c0_12, %c0_13] : memref<1x256xf32, #tpu.memory_space<vmem>>, vector<1x256xf32>
      tpu.vector_store %arg3[%c0_12, %c0_13], %18 {strides = array<i32>} : memref<1x256xf32, #tpu.memory_space<vmem>>, vector<1x256xf32>,
    } else {
    }
    return
  }
  func.func @transform_0(%arg0: i32, %arg1: i32) -> (i32, i32) {
    %c0_i32 = arith.constant 0 : i32
    return %arg1, %arg0 : i32, i32
  }
  func.func @transform_1(%arg0: i32, %arg1: i32) -> (i32, i32) {
    %c0_i32 = arith.constant 0 : i32
    %c0_i32_0 = arith.constant 0 : i32
    return %c0_i32, %arg0 : i32, i32
  }
}

</mosaic_0001>

<bundles_post_ra>
// kernel: tpu_custom_call.1
= control target key start
LH: loop header
LB: loop body
LE: loop exit
PB: predicated region body
PF: predicated region fallthrough
CT: control target
= control target key end

     0   :  { %6 = vsyncpa [#allocation4], 0  ;;  %s192_s0 = inlined_call_operand.hbm [shape: f32[8,256], index: 0, kind: input, shape index: {}]   ;;  %s193_s1 = inlined_call_operand.hbm [shape: f32[1,256], index: 1, kind: output, shape index: {}]  }
   0x1   :  { %7 = vsyncpa [#allocation5], 0  ;;  %s155_s6 = smov [#allocation3]   ;;  %s107_s10 = scalar_lea.hbm %s192_s0, 256 }
   0x2   :  { %s14_s7 = sshll.u32 %s155_s6, 4  ;;  %p108_p0 = scmp.ne.s32.totalorder %s192_s0, %s107_s10  ;;  %s15_s7 = int_to_ptr.vmem [resolvable:$true] %s14_s7 }
   0x3   :  { %p111_p1 = scmp.lt.u32.totalorder %s107_s10, %s192_s0 }
   0x5   :  { %p113_p2 = pnand %p111_p1, %p108_p0 }
   0x7   :  { %116 = shalt.err (!%p113_p2)
}
   0x8   :  { %s117_s15 = scalar_lea.vmem %s15_s7, 256  ;;  %p122_p4 = scmp.lt.s32.totalorder %s15_s7, %s15_s7 }
   0x9   :  { %p118_p3 = scmp.ne.s32.totalorder %s15_s7, %s117_s15  ;;  %p123_p5 = scmp.lt.s32.totalorder %s117_s15, %s117_s15 }
   0xb   :  { %p124_p6 = por %p123_p5, %p122_p4 }
   0xd   :  { %p125_p7 = pnand %p124_p6, %p118_p3 }
   0xf   :  { %128 = shalt.err (!%p125_p7)
}
  0x10   :  { %17 = dma.hbm_to_vmem [thread:$0]  %s192_s0, 256, %s15_s7, [#allocation4]  }
  0x11   :  { %151 = dma.done.wait [#allocation4], 256  }
  0x12   :  { %152 = vsyncadd [#allocation4], 4294967040  ;;  %v27_v0 = vld [vmem:[#allocation3] sm:$0xff]  ;;  %v28_v1 = vld [vmem:[#allocation3 + $0x8] sm:$0xff]  ;;  %v156_v14 = vmov 1966171168   ;;  %v68_v16 = vlaneseq }
  0x13   :  { %103 = vlog2.f32 %v27_v0  ;;  %v66_v15 = vunpack.c.l.s4 %v156_v14  ;;  %s157_s0 = smov [#allocation6]  }
  0x14   :  { %105 = vlog2.f32 %v28_v1  ;;  %v69_v22 = vshrl.u32 %v68_v16, 7  ;;  %s91_s18 = sshll.u32 %s157_s0, 4  ;;  %vm82_vm0 = vcmp.lt.s32.totalorder %v68_v16, 256  ;;  %s92_s18 = int_to_ptr.vmem [resolvable:$true] %s91_s18 }
  0x15   :  { %v67_v21 = vunpack.c.0.s8 %v66_v15  ;;  %s129_s19 = scalar_lea.vmem %s92_s18, 32  ;;  %p134_p9 = scmp.lt.s32.totalorder %s92_s18, %s92_s18 }
  0x16   :  { %p130_p8 = scmp.ne.s32.totalorder %s92_s18, %s129_s19  ;;  %p135_p10 = scmp.lt.s32.totalorder %s129_s19, %s129_s19 }
  0x17   :  { %v70_v27 = vsub.s32 %v67_v21, %v69_v22 }
  0x18   :  { %p136_p11 = por %p135_p10, %p134_p9 }
  0x1a   :  { %p137_p12 = pnand %p136_p11, %p130_p8 }
  0x1d   :  { %v104_v2 = vpop.eup %103 }
  0x1e   :  { %v106_v3 = vpop.eup %105  ;;  %v30_v4 = vmul.f32 0.6931472, %v104_v2 }
  0x1f   :  { %v32_v5 = vmul.f32 0.6931472, %v106_v3 }
  0x20   :  { %v33_v6 = vmul.f32 %v30_v4, %v27_v0 }
  0x21   :  { %v34_v7 = vmul.f32 %v32_v5, %v28_v1 }
  0x22   :  { %v48_v8 = vrot.slane %v33_v6, 4 }
  0x23   :  { %v54_v9 = vrot.slane %v34_v7, 4 }
  0x24   :  { %v49_v10 = vadd.f32 %v48_v8, %v33_v6 }
  0x25   :  { %v55_v11 = vadd.f32 %v54_v9, %v34_v7 }
  0x26   :  { %v50_v12 = vrot.slane %v49_v10, 2 }
  0x27   :  { %v56_v13 = vrot.slane %v55_v11, 2 }
  0x28   :  { %v51_v17 = vadd.f32 %v50_v12, %v49_v10 }
  0x29   :  { %v57_v18 = vadd.f32 %v56_v13, %v55_v11 }
  0x2a   :  { %v52_v19 = vrot.slane %v51_v17, 1 }
  0x2b   :  { %v58_v20 = vrot.slane %v57_v18, 1 }
  0x2c   :  { %v53_v23 = vadd.f32 %v52_v19, %v51_v17 }
  0x2d   :  { %v59_v24 = vadd.f32 %v58_v20, %v57_v18 }
  0x2e   :  { %v60_v25 = vmul.f32 -0.5, %v53_v23 }
  0x2f   :  { %v61_v26 = vmul.f32 -0.5, %v59_v24 }
  0x31   :  { %v64_v28 = vcombine.low %v60_v25, %v61_v26 }
  0x33   :  { %v71_v29 = vrot.slane %v64_v28, %v70_v27 }
  0x35   :  { %v78_v30 = vrot.slane %v71_v29, %v70_v27 }
  0x37   :  { %84 = vst.msk [vmem:[#allocation6] sm:$0x3] %vm82_vm0, %v78_v30 }
  0x38   :  { %140 = shalt.err (!%p137_p12)
}
  0x39   :  { %s141_s22 = scalar_lea.hbm %s193_s1, 32 }
  0x3a   :  { %p142_p13 = scmp.ne.s32.totalorder %s193_s1, %s141_s22  ;;  %p145_p0 = scmp.lt.u32.totalorder %s141_s22, %s193_s1 }
  0x3c   :  { %p147_p1 = pnand %p145_p0, %p142_p13 }
  0x3e   :  { %150 = shalt.err (!%p147_p1)
}
  0x3f   :  { %94 = dma.vmem_to_hbm [thread:$0]  %s92_s18, 32, %s193_s1, [#allocation5]  }
  0x40   :  { %153 = dma.done.wait [#allocation5], 32  }
  0x41   :  { %154 = vsyncadd [#allocation5], 4294967264 }
  0x42   :  { %98 = vsyncpa [#allocation4], 1 }
  0x43   :  { %99 = vsyncpa [#allocation5], 1 }

</bundles_post_ra>
